<compile_context>
chip_gen: v6e
topology: v6e:2x2x1
jax: 0.10.0
libtpu: 0.0.40
codegen_flags: <defaults>
</compile_context>

<pallas_src>
import functools

import jax
import jax.numpy as jnp
from jax.experimental import pallas as pl
from jax.experimental.pallas import tpu as pltpu


# ---------------------------------------------------------------------------
# Kernel
# ---------------------------------------------------------------------------
def _make_cross_stitch_kernel(num_tasks):
    T = num_tasks

    def kernel(*refs):
        # refs = (x_0, ..., x_{T-1}, scales, o_0, ..., o_{T-1})
        x_refs = refs[:T]
        s_ref = refs[T]
        o_refs = refs[T + 1:]

        xs = [x_ref[...] for x_ref in x_refs]          # each (tR, tL) f32
        s = s_ref[...]                                  # (T, T, tR, 1) f32

        for i in range(T):                              # static unroll over tasks
            acc = xs[0] * s[i, 0]                       # (tR, tL) * (tR, 1)
            for j in range(1, T):
                acc = acc + xs[j] * s[i, j]             # FMA-style accumulate
            o_refs[i][...] = acc.astype(o_refs[i].dtype)

    return kernel


@functools.partial(jax.jit, static_argnames=("tR", "tL"))
def _cross_stitch_apply(xs_flat, scales, tR, tL):
    """xs_flat: tuple of T arrays (R, L); scales: (T, T, R, 1) -> tuple of T (R, L)."""
    T = len(xs_flat)
    R, L = xs_flat[0].shape
    grid = (R // tR, L // tL)

    feat_spec = lambda: pl.BlockSpec((tR, tL), lambda r, l: (r, l))
    in_specs = [feat_spec() for _ in range(T)]
    in_specs.append(pl.BlockSpec((T, T, tR, 1), lambda r, l: (0, 0, r, 0)))
    out_specs = tuple(feat_spec() for _ in range(T))
    out_shape = tuple(
        jax.ShapeDtypeStruct((R, L), xs_flat[0].dtype) for _ in range(T)
    )

    return pl.pallas_call(
        _make_cross_stitch_kernel(T),
        out_shape=out_shape,
        grid=grid,
        in_specs=in_specs,
        out_specs=out_specs,
        compiler_params=pltpu.CompilerParams(
            dimension_semantics=("parallel", "parallel"),
            vmem_limit_bytes=32 * 1024 * 1024,
        ),
    )(*xs_flat, scales)


# ---------------------------------------------------------------------------
# Wrappers
# ---------------------------------------------------------------------------
def _round_up(x, m):
    return (x + m - 1) // m * m


def _pick_tile(dim, align, max_tile):
    """Largest multiple of `align` that divides `dim` and is <= max_tile."""
    best = align
    t = align
    while t <= min(dim, max_tile):
        if dim % t == 0:
            best = t
        t += align
    return best


def make_cross_stitch_params(num_tasks, num_channels, alpha, beta, dtype=jnp.float32):
    """param[i, j, c] = alpha if i == j else beta  (ChannelWiseMultiply.init_value)."""
    eye = jnp.eye(num_tasks, dtype=dtype)[:, :, None]            # (T, T, 1)
    params = alpha * eye + beta * (1.0 - eye)                    # (T, T, 1)
    return jnp.broadcast_to(params, (num_tasks, num_tasks, num_channels)).astype(dtype)


def _cross_stitch_jnp(task_features, params):
    """Plain-jnp path (used when the op is too small to be worth a pallas_call)."""
    names = list(task_features.keys())
    out = {}
    for ii, t_i in enumerate(names):
        acc = None
        for jj, t_j in enumerate(names):
            term = params[ii, jj][None, :, None, None] * task_features[t_j]
            acc = term if acc is None else acc + term
        out[t_i] = acc
    return out


def cross_stitch_unit(task_features, params, *, tr_max=256, tl_max=512,
                      min_pallas_bytes=0):
    """Pallas equivalent of CrossStitchUnit.forward.

    task_features: dict {task_name: (N, C, H, W) f32}  (NCHW, PyTorch convention)
    params:        (T, T, C) f32, rows/cols ordered like list(task_features.keys())
    returns dict with same keys / shapes.

    min_pallas_bytes: if the total feature bytes are below this, fall back to
    plain jnp (the ~0.35us/grid-step + call overhead dominates for tiny maps).
    Default 0 so the Pallas path is always exercised.
    """
    names = list(task_features.keys())
    T = len(names)
    N, C, H, W = task_features[names[0]].shape
    for n in names:
        assert task_features[n].shape == (N, C, H, W), \
            "cross-stitch requires matching feature shapes (resize_features is external)"

    total_bytes = T * N * C * H * W * task_features[names[0]].dtype.itemsize
    if total_bytes < min_pallas_bytes:
        return _cross_stitch_jnp(task_features, params)

    R, L = N * C, H * W
    R_pad = _round_up(R, 8)
    L_pad = _round_up(L, 128)          # keep the lane dim 128-aligned (dense vst)

    xs_flat = []
    for n in names:
        xf = task_features[n].reshape(R, L)
        if (R_pad, L_pad) != (R, L):
            xf = jnp.pad(xf, ((0, R_pad - R), (0, L_pad - L)))
        xs_flat.append(xf)

    # per-channel scale broadcast over batch, rows on the sublane axis,
    # trailing size-1 lane dim: (T, T, C) -> (T, T, R_pad, 1)
    scales = jnp.broadcast_to(params[:, :, None, :], (T, T, N, C)).reshape(T, T, R)
    if R_pad != R:
        scales = jnp.pad(scales, ((0, 0), (0, 0), (0, R_pad - R)))
    scales = scales[..., None].astype(jnp.float32)

    tR = _pick_tile(R_pad, 8, tr_max)
    tL = _pick_tile(L_pad, 128, tl_max)

    outs = _cross_stitch_apply(tuple(xs_flat), scales, tR, tL)

    result = {}
    for i, n in enumerate(names):
        result[n] = outs[i][:R, :L].reshape(N, C, H, W)
    return result


class CrossStitchNetworkPallas:
    """Cross-stitch portion of CrossStitchNetwork (the part defined by this module).

    Applies a CrossStitchUnit per stage to the per-dataset feature maps.
    Backbone stages / stems / FPN / heads are external nn.Modules in the
    original code and are not synthesized here.
    """

    def __init__(self, datasets, stages, channels, alpha, beta):
        self.datasets = list(datasets)
        self.stages = list(stages)
        T = len(self.datasets)
        self.cross_stitch = {
            stage: make_cross_stitch_params(T, channels[stage], alpha, beta)
            for stage in stages
        }

    def forward_features(self, data):
        """data: dict {dset: (N, C, H, W)} features entering the first stage."""
        return_features = {k: {} for k in self.datasets}
        for i, stage in enumerate(self.stages):
            # TODO(synk): per-dataset backbone stage `layer(data[dset])` and
            # resize_features to the shared (mean_h, mean_w) live in external models.
            data = cross_stitch_unit(data, self.cross_stitch[stage])
            for dset in self.datasets:
                return_features[dset][str(i)] = data[dset]
        return return_features


# ---------------------------------------------------------------------------
# Reference + demo
# ---------------------------------------------------------------------------
def _reference_cross_stitch(task_features, params):
    """Pure-jnp reference matching CrossStitchUnit.forward semantics."""
    names = list(task_features.keys())
    out = {}
    for ii, t_i in enumerate(names):
        acc = None
        for jj, t_j in enumerate(names):
            term = params[ii, jj][None, :, None, None] * task_features[t_j]
            acc = term if acc is None else acc + term
        out[t_i] = acc
    return out


if __name__ == "__main__":
    key = jax.random.PRNGKey(0)
    datasets = ["dset_a", "dset_b"]
    stages = ["layer1", "layer2"]
    channels = {"layer1": 4, "layer2": 4}
    alpha, beta = 0.9, 0.1
    N, C, H, W = 2, 4, 16, 16

    net = CrossStitchNetworkPallas(datasets, stages, channels, alpha, beta)

    k1, k2 = jax.random.split(key)
    data = {
        "dset_a": jax.random.normal(k1, (N, C, H, W), dtype=jnp.float32),
        "dset_b": jax.random.normal(k2, (N, C, H, W), dtype=jnp.float32),
    }

    feats = net.forward_features(data)
    jax.block_until_ready(feats)

    # correctness check of the Pallas cross-stitch against a jnp reference
    ref = data
    for stage in stages:
        ref = _reference_cross_stitch(ref, net.cross_stitch[stage])
    for dset in datasets:
        got = feats[dset][str(len(stages) - 1)]
        want = ref[dset]
        assert got.shape == (N, C, H, W)
        assert jnp.allclose(got, want, atol=1e-5, rtol=1e-5), dset

    print("KERNEL_OK")
</pallas_src>

<mosaic_0001>
module attributes {stable_mosaic.version = 11 : i64} {
  func.func @kernel(%arg0: i32, %arg1: i32, %arg2: memref<8x256xf32, #tpu.memory_space<vmem>>, %arg3: memref<8x256xf32, #tpu.memory_space<vmem>>, %arg4: memref<2x2x8x1xf32, #tpu.memory_space<vmem>>, %arg5: memref<8x256xf32, #tpu.memory_space<vmem>>, %arg6: memref<8x256xf32, #tpu.memory_space<vmem>>) attributes {dimension_semantics = [#tpu.dimension_semantics<parallel>, #tpu.dimension_semantics<parallel>], iteration_bounds = array<i64: 1, 1>, scalar_prefetch = 0 : i64, scratch_operands = 0 : i64, tpu.core_type = #tpu.core_type<tc>, window_params = [{transform_indices = @transform_0, window_bounds = array<i64: 8, 256>}, {transform_indices = @transform_1, window_bounds = array<i64: 8, 256>}, {transform_indices = @transform_2, window_bounds = array<i64: 2, 2, 8, 1>}, {transform_indices = @transform_3, window_bounds = array<i64: 8, 256>}, {transform_indices = @transform_4, window_bounds = array<i64: 8, 256>}]} {
    %c0 = arith.constant 0 : index
    %c0_0 = arith.constant 0 : index
    %0 = vector.load %arg2[%c0, %c0_0] : memref<8x256xf32, #tpu.memory_space<vmem>>, vector<8x256xf32>
    %c0_1 = arith.constant 0 : index
    %c0_2 = arith.constant 0 : index
    %1 = vector.load %arg3[%c0_1, %c0_2] : memref<8x256xf32, #tpu.memory_space<vmem>>, vector<8x256xf32>
    %c0_3 = arith.constant 0 : index
    %c0_4 = arith.constant 0 : index
    %c0_5 = arith.constant 0 : index
    %c0_6 = arith.constant 0 : index
    %2 = vector.load %arg4[%c0_3, %c0_4, %c0_5, %c0_6] : memref<2x2x8x1xf32, #tpu.memory_space<vmem>>, vector<2x2x8x1xf32>
    %3 = vector.extract_strided_slice %2 {offsets = [0, 0, 0, 0], sizes = [1, 1, 8, 1], strides = [1, 1, 1, 1]} : vector<2x2x8x1xf32> to vector<1x1x8x1xf32>
    %4 = vector.shape_cast %3 : vector<1x1x8x1xf32> to vector<8x1xf32>
    %5 = vector.broadcast %4 : vector<8x1xf32> to vector<8x256xf32>
    %6 = arith.mulf %0, %5 : vector<8x256xf32>
    %7 = vector.extract_strided_slice %2 {offsets = [0, 1, 0, 0], sizes = [1, 1, 8, 1], strides = [1, 1, 1, 1]} : vector<2x2x8x1xf32> to vector<1x1x8x1xf32>
    %8 = vector.shape_cast %7 : vector<1x1x8x1xf32> to vector<8x1xf32>
    %9 = vector.broadcast %8 : vector<8x1xf32> to vector<8x256xf32>
    %10 = arith.mulf %1, %9 : vector<8x256xf32>
    %11 = arith.addf %6, %10 : vector<8x256xf32>
    %c0_7 = arith.constant 0 : index
    %c0_8 = arith.constant 0 : index
    %12 = vector.load %arg5[%c0_7, %c0_8] : memref<8x256xf32, #tpu.memory_space<vmem>>, vector<8x256xf32>
    tpu.vector_store %arg5[%c0_7, %c0_8], %11 {strides = array<i32>} : memref<8x256xf32, #tpu.memory_space<vmem>>, vector<8x256xf32>,
    %13 = vector.extract_strided_slice %2 {offsets = [1, 0, 0, 0], sizes = [1, 1, 8, 1], strides = [1, 1, 1, 1]} : vector<2x2x8x1xf32> to vector<1x1x8x1xf32>
    %14 = vector.shape_cast %13 : vector<1x1x8x1xf32> to vector<8x1xf32>
    %15 = vector.broadcast %14 : vector<8x1xf32> to vector<8x256xf32>
    %16 = arith.mulf %0, %15 : vector<8x256xf32>
    %17 = vector.extract_strided_slice %2 {offsets = [1, 1, 0, 0], sizes = [1, 1, 8, 1], strides = [1, 1, 1, 1]} : vector<2x2x8x1xf32> to vector<1x1x8x1xf32>
    %18 = vector.shape_cast %17 : vector<1x1x8x1xf32> to vector<8x1xf32>
    %19 = vector.broadcast %18 : vector<8x1xf32> to vector<8x256xf32>
    %20 = arith.mulf %1, %19 : vector<8x256xf32>
    %21 = arith.addf %16, %20 : vector<8x256xf32>
    %c0_9 = arith.constant 0 : index
    %c0_10 = arith.constant 0 : index
    %22 = vector.load %arg6[%c0_9, %c0_10] : memref<8x256xf32, #tpu.memory_space<vmem>>, vector<8x256xf32>
    tpu.vector_store %arg6[%c0_9, %c0_10], %21 {strides = array<i32>} : memref<8x256xf32, #tpu.memory_space<vmem>>, vector<8x256xf32>,
    return
  }
  func.func @transform_0(%arg0: i32, %arg1: i32) -> (i32, i32) {
    %c0_i32 = arith.constant 0 : i32
    return %arg0, %arg1 : i32, i32
  }
  func.func @transform_1(%arg0: i32, %arg1: i32) -> (i32, i32) {
    %c0_i32 = arith.constant 0 : i32
    return %arg0, %arg1 : i32, i32
  }
  func.func @transform_2(%arg0: i32, %arg1: i32) -> (i32, i32, i32, i32) {
    %c0_i32 = arith.constant 0 : i32
    %c0_i32_0 = arith.constant 0 : i32
    %c0_i32_1 = arith.constant 0 : i32
    %c0_i32_2 = arith.constant 0 : i32
    return %c0_i32, %c0_i32_0, %arg0, %c0_i32_1 : i32, i32, i32, i32
  }
  func.func @transform_3(%arg0: i32, %arg1: i32) -> (i32, i32) {
    %c0_i32 = arith.constant 0 : i32
    return %arg0, %arg1 : i32, i32
  }
  func.func @transform_4(%arg0: i32, %arg1: i32) -> (i32, i32) {
    %c0_i32 = arith.constant 0 : i32
    return %arg0, %arg1 : i32, i32
  }
}

</mosaic_0001>

<bundles_post_ra>
// kernel: _cross_stitch_apply.1
= control target key start
LH: loop header
LB: loop body
LE: loop exit
PB: predicated region body
PF: predicated region fallthrough
CT: control target
= control target key end

     0   :  { %10 = vsyncpa [#allocation3], 0  ;;  %v139_v2 = vmov 0   ;;  %s197_s0 = inlined_call_operand.vmem [shape: f32[8,256], index: 0, kind: input, shape index: {}]   ;;  %s198_s1 = inlined_call_operand.vmem [shape: f32[8,256], index: 1, kind: input, shape index: {}]   ;;  %s199_s2 = inlined_call_operand.vmem [shape: f32[2,2,8,1], index: 2, kind: input, shape index: {}]   ;;  %s200_s3 = inlined_call_operand.hbm [shape: f32[8,256], index: 3, kind: output, shape index: {0}]   ;;  %s201_s4 = inlined_call_operand.hbm [shape: f32[8,256], index: 4, kind: output, shape index: {1}]  }
   0x1   :  { %v24_v0 = vld [vmem:[%s199_s2 + $0x10] sm:$0xff]  ;;  %v22_v1 = vld [vmem:[%s199_s2] sm:$0xff]  ;;  %94 = vset.pattern.permute.xlu1 %v139_v2  ;;  %93 = vset.pattern.permute.xlu0 %v139_v2 }
   0x2   :  { %46 = vperm.xlu1 %94, %v24_v0   ;;  %28 = vperm.xlu0 %93, %v22_v1  }
   0x3   :  { %11 = vsyncpa [#allocation5], 0  ;;  %v25_v3 = vld [vmem:[%s199_s2 + $0x18] sm:$0xff]  ;;  %v23_v4 = vld [vmem:[%s199_s2 + $0x8] sm:$0xff]  ;;  %s140_s2 = smov [#allocation2]  }
   0x4   :  { %v18_v7 = vld [vmem:[%s197_s0] sm:$0xff]  ;;  %v19_v8 = vld [vmem:[%s197_s0 + $0x8] sm:$0xff]  ;;  %s68_s5 = sshll.u32 %s140_s2, 4  ;;  %s141_s0 = smov [#allocation4]   ;;  %s69_s5 = int_to_ptr.vmem [resolvable:$true] %s68_s5 }
   0x5   :  { %v20_v9 = vld [vmem:[%s198_s1] sm:$0xff]  ;;  %v21_v10 = vld [vmem:[%s198_s1 + $0x8] sm:$0xff]  ;;  %s78_s6 = sshll.u32 %s141_s0, 4  ;;  %s95_s1 = scalar_lea.vmem %s69_s5, 256  ;;  %s79_s6 = int_to_ptr.vmem [resolvable:$true] %s78_s6 }
   0x6   :  { %53 = vperm.xlu1 %94, %v25_v3   ;;  %35 = vperm.xlu0 %93, %v23_v4   ;;  %p96_p0 = scmp.ne.s32.totalorder %s69_s5, %s95_s1  ;;  %p100_p1 = scmp.lt.s32.totalorder %s69_s5, %s69_s5 }
   0x7   :  { %p101_p2 = scmp.lt.s32.totalorder %s95_s1, %s95_s1 }
   0x9   :  { %p102_p3 = por %p101_p2, %p100_p1 }
   0xb   :  { %p103_p4 = pnand %p102_p3, %p96_p0 }
  0x7d   :  { %v47_v5 = vpop.permute.xlu1 %46  ;;  %v29_v6 = vpop.permute.xlu0 %28 }
  0x7e   :  { %v49_v11 = vmul.f32 %v47_v5, %v18_v7  ;;  %v50_v12 = vmul.f32 %v47_v5, %v19_v8  ;;  %v31_v13 = vmul.f32 %v29_v6, %v18_v7  ;;  %v32_v14 = vmul.f32 %v29_v6, %v19_v8 }
  0x81   :  { %v54_v15 = vpop.permute.xlu1 %53  ;;  %v36_v16 = vpop.permute.xlu0 %35 }
  0x82   :  { %v56_v17 = vmul.f32 %v54_v15, %v20_v9  ;;  %v57_v18 = vmul.f32 %v54_v15, %v21_v10  ;;  %v38_v19 = vmul.f32 %v36_v16, %v20_v9  ;;  %v39_v20 = vmul.f32 %v36_v16, %v21_v10 }
  0x84   :  { %v58_v21 = vadd.f32 %v56_v17, %v49_v11  ;;  %v59_v22 = vadd.f32 %v57_v18, %v50_v12  ;;  %v40_v23 = vadd.f32 %v38_v19, %v31_v13  ;;  %v41_v24 = vadd.f32 %v39_v20, %v32_v14 }
  0x86   :  { %60 = vst [vmem:[#allocation4] sm:$0xff] %v58_v21  ;;  %61 = vst [vmem:[#allocation4 + $0x8] sm:$0xff] %v59_v22 }
  0x87   :  { %42 = vst [vmem:[#allocation2] sm:$0xff] %v40_v23  ;;  %43 = vst [vmem:[#allocation2 + $0x8] sm:$0xff] %v41_v24 }
  0x88   :  { %106 = shalt.err (!%p103_p4)
}
  0x89   :  { %71 = dma.vmem_to_hbm [thread:$0]  %s69_s5, 256, %s200_s3, [#allocation3]  }
  0x8a   :  { %s115_s9 = scalar_lea.vmem %s79_s6, 256  ;;  %p120_p6 = scmp.lt.s32.totalorder %s79_s6, %s79_s6 }
  0x8b   :  { %p116_p5 = scmp.ne.s32.totalorder %s79_s6, %s115_s9  ;;  %p121_p7 = scmp.lt.s32.totalorder %s115_s9, %s115_s9 }
  0x8d   :  { %p122_p8 = por %p121_p7, %p120_p6 }
  0x8f   :  { %p123_p9 = pnand %p122_p8, %p116_p5 }
  0x91   :  { %126 = shalt.err (!%p123_p9)
}
  0x92   :  { %81 = dma.vmem_to_hbm [thread:$0]  %s79_s6, 256, %s201_s4, [#allocation5]  }
  0x93   :  { %135 = dma.done.wait [#allocation3], 256  }
  0x94   :  { %136 = vsyncadd [#allocation3], 4294967040 }
  0x95   :  { %137 = dma.done.wait [#allocation5], 256  }
  0x96   :  { %138 = vsyncadd [#allocation5], 4294967040 }
  0x97   :  { %88 = vsyncpa [#allocation3], 1 }
  0x98   :  { %89 = vsyncpa [#allocation5], 1 }

</bundles_post_ra>
